<compile_context>
chip_gen: v7x
topology: tpu7x:2x2x1
jax: 0.10.0
libtpu: 0.0.40
codegen_flags: <defaults>
</compile_context>

<pallas_src>
import jax
import jax.numpy as jnp
from jax.experimental import pallas as pl
from jax.experimental.pallas import tpu as pltpu


def _round_up(x, m):
    return -(-x // m) * m


# --------------------------------------------------------------------------- #
# Kernel: one grid step = (tile_p1 p1 rows) x (all p2) x (one chunk of G labels)
# --------------------------------------------------------------------------- #
def _psi_kernel(act_ref, bt_ref, w2_ref, out_ref):
    """
    act_ref: (1, tile_p1, 1, G*Fp)  A[p1] + C[l], label chunk folded into lanes
    bt_ref:  (1, P, G*Fp)           B[p2] tiled across the chunk (VMEM resident)
    w2_ref:  (G*Fp, G*TT)           kron(I_G, psi_2)             (VMEM resident)
    out_ref: (tile_p1, P, G*TT)     lane-dense output block
    """
    tile_p1, P, GTT = out_ref.shape
    GFp = w2_ref.shape[0]

    # (tile_p1, 1, GFp) + (1, P, GFp) -> (tile_p1, P, GFp); tanh on the EUP.
    g = jnp.tanh(act_ref[0] + bt_ref[...])

    # Single fused MXU matmul with M = tile_p1 * P rows; result lands directly
    # in the lane-dense (p1, p2, l*T*T) layout -> one full-width block store.
    res = jnp.dot(
        g.reshape(tile_p1 * P, GFp),
        w2_ref[...],
        preferred_element_type=jnp.float32,
    )
    out_ref[...] = res.reshape(tile_p1, P, GTT).astype(out_ref.dtype)


# --------------------------------------------------------------------------- #
# Sizing helpers
# --------------------------------------------------------------------------- #
def _pick_label_chunk(L, TT):
    """Smallest divisor G of L with G*TT a multiple of 128 (lane-dense,
    (8,128)-legal output blocks). Falls back to G = L (block == full dim)."""
    target = max(1, -(-128 // TT))
    for g in range(1, L + 1):
        if L % g == 0 and g >= target and (g * TT) % 128 == 0:
            return g
    return L


def _pad2(rows, cols):
    """f32 words of one (rows, cols) VMEM tile after (8,128) padding."""
    return _round_up(max(rows, 1), 8) * _round_up(max(cols, 1), 128)


def _est_vmem_bytes(tile_p1, P, GFp, GTT):
    act_blk = 2 * tile_p1 * _pad2(1, GFp)            # double-buffered input blk
    bt_res = 2 * _pad2(P, GFp)                       # resident (2 buffers)
    w2_res = 2 * _pad2(GFp, GTT)                     # resident (2 buffers)
    out_blk = 2 * tile_p1 * _pad2(P, GTT)            # double-buffered output blk
    tmp = tile_p1 * (_pad2(P, GFp) + _pad2(P, GTT))  # in-kernel g and res
    return 4 * (act_blk + bt_res + w2_res + out_blk + tmp)


def _pick_tile_p1(P, GFp, GTT, budget_bytes, min_steps):
    divisors = [d for d in range(1, P + 1) if P % d == 0]
    # keep the second-minor block dim (8,128)-friendly where possible
    cands = [d for d in divisors if d == P or d % 8 == 0] or divisors
    fitting = [d for d in cands if _est_vmem_bytes(d, P, GFp, GTT) <= budget_bytes]
    if not fitting:
        fitting = [min(cands)]
    preferred = [d for d in fitting if P // d >= min_steps]
    pool = preferred if preferred else fitting
    return max(pool)


# --------------------------------------------------------------------------- #
# Wrapper
# --------------------------------------------------------------------------- #
def neural_mrf_psi(pos, labels, W, psi_2):
    """psi[p1,p2,l] = tanh(concat(pos[p1], pos[p2], labels[l]) @ W) @ psi_2.

    pos: (P, n)   labels: (L, n)   W: (3n, 3n)   psi_2: (3n, T, T)
    returns (P, P, L, T, T) float32.
    """
    P, n = pos.shape
    L, _ = labels.shape
    F = 3 * n
    F2, T, _ = psi_2.shape
    assert F2 == F

    f32 = jnp.float32
    pos = pos.astype(f32)
    labels = labels.astype(f32)
    W = W.astype(f32)
    psi_2 = psi_2.astype(f32)

    TT = T * T

    # ---- label chunking: G labels folded into lanes per grid step ----------
    G = _pick_label_chunk(L, TT)
    LC = L // G
    GTT = G * TT

    # ---- feature padding: 8-aligned, bumped to a 128-lane K when cheap -----
    Fp = _round_up(F, 8)
    for cand in range(Fp, 2 * Fp + 1, 8):
        if (G * cand) % 128 == 0:
            Fp = cand
            break
    GFp = G * Fp

    # ---- tiny plain-JAX precompute (psi_1 is never materialized) -----------
    A = pos @ W[:n]                # (P, F) contribution of pos[p1]
    B = pos @ W[n:2 * n]           # (P, F) contribution of pos[p2]
    C = labels @ W[2 * n:]         # (L, F) contribution of labels[l]
    pad = ((0, 0), (0, Fp - F))
    A = jnp.pad(A, pad)
    B = jnp.pad(B, pad)
    C = jnp.pad(C, pad)
    psi2p = jnp.pad(psi_2.reshape(F, TT), ((0, Fp - F), (0, 0)))   # (Fp, TT)

    # AC[c, p1, 0, g*Fp + f] = A[p1, f] + C[c*G + g, f]
    AC = (A[None, :, None, :] + C.reshape(LC, 1, G, Fp)).reshape(LC, P, 1, GFp)
    # Bt[0, p2, g*Fp + f] = B[p2, f]   (only G-fold tiling, never L-fold)
    Bt = jnp.tile(B, (1, G)).reshape(1, P, GFp)
    # Block-diagonal projection so a single matmul lands in (.., l*T*T) layout.
    W2 = jnp.kron(jnp.eye(G, dtype=f32), psi2p)                    # (GFp, GTT)

    # ---- per-generation tiling from the actual chip's VMEM capacity --------
    try:
        info = pltpu.get_tpu_info()
        vmem_cap = int(getattr(info, "vmem_capacity_bytes", 64 * 2 ** 20))
    except Exception:
        vmem_cap = 64 * 2 ** 20
    budget = int(0.70 * vmem_cap)
    total_out_bytes = P * P * L * TT * 4
    # only force >=2 parallel steps (for v7x's two TCs) when the work is big
    min_steps = 2 if total_out_bytes > (8 * 2 ** 20) else 1
    tile_p1 = _pick_tile_p1(P, GFp, GTT, budget, min_steps)

    est = _est_vmem_bytes(tile_p1, P, GFp, GTT)
    vmem_limit = int(min(max(32 * 2 ** 20, 2 * est), int(0.9 * vmem_cap)))

    grid = (P // tile_p1, LC)

    out = pl.pallas_call(
        _psi_kernel,
        out_shape=jax.ShapeDtypeStruct((P, P, L * TT), f32),
        grid_spec=pltpu.PrefetchScalarGridSpec(
            num_scalar_prefetch=0,
            grid=grid,
            in_specs=[
                pl.BlockSpec((1, tile_p1, 1, GFp), lambda i, c: (c, i, 0, 0)),
                pl.BlockSpec((1, P, GFp), lambda i, c: (0, 0, 0)),  # resident
                pl.BlockSpec((GFp, GTT), lambda i, c: (0, 0)),      # resident
            ],
            out_specs=pl.BlockSpec((tile_p1, P, GTT), lambda i, c: (i, 0, c)),
        ),
        compiler_params=pltpu.CompilerParams(
            dimension_semantics=("parallel", "parallel"),
            vmem_limit_bytes=vmem_limit,
        ),
    )(AC, Bt, W2)

    return out.reshape(P, P, L, T, T)


# --------------------------------------------------------------------------- #
# Pure-JAX reference mirroring the torch code path
# --------------------------------------------------------------------------- #
def neural_mrf_psi_ref(pos, labels, W, psi_2):
    P, n = pos.shape
    L, _ = labels.shape
    pos1 = jnp.broadcast_to(pos[:, None, None, :], (P, P, L, n))
    pos2 = jnp.broadcast_to(pos[None, :, None, :], (P, P, L, n))
    lab = jnp.broadcast_to(labels[None, None, :, :], (P, P, L, n))
    psi_1 = jnp.concatenate([pos1, pos2, lab], axis=-1)  # (P, P, L, 3n)
    h = jnp.tanh(jnp.tensordot(psi_1, W, 1))
    return jnp.tensordot(h, psi_2, 1)  # (P, P, L, T, T)


if __name__ == "__main__":
    # Small, deterministic synthetic parameters matching __init__ shapes
    # (non-linear branch): pos (num_pos, n), labels (num_labels, n),
    # W (3n, 3n), psi_2 (3n, num_tags, num_tags), n = 3.
    num_pos, num_labels, num_tags, n = 16, 8, 4, 3

    key = jax.random.PRNGKey(0)
    k_pos, k_lab, k_w, k_psi2 = jax.random.split(key, 4)
    pos = jax.random.normal(k_pos, (num_pos, n), dtype=jnp.float32)
    labels = jax.random.normal(k_lab, (num_labels, n), dtype=jnp.float32)
    W = jax.random.normal(k_w, (3 * n, 3 * n), dtype=jnp.float32)
    psi_2 = jax.random.normal(k_psi2, (3 * n, num_tags, num_tags), dtype=jnp.float32)

    psi = jax.block_until_ready(neural_mrf_psi(pos, labels, W, psi_2))

    ref = neural_mrf_psi_ref(pos, labels, W, psi_2)
    assert psi.shape == (num_pos, num_pos, num_labels, num_tags, num_tags)
    max_err = float(jnp.max(jnp.abs(psi - ref)))
    assert jnp.allclose(psi, ref, atol=1e-4, rtol=1e-4), max_err

    print("KERNEL_OK")
</pallas_src>

<mosaic_0001>
module attributes {stable_mosaic.version = 11 : i64} {
  func.func @_psi_kernel(%arg0: i32, %arg1: i32, %arg2: memref<1x16x1x128xf32, #tpu.memory_space<vmem>>, %arg3: memref<1x16x128xf32, #tpu.memory_space<vmem>>, %arg4: memref<128x128xf32, #tpu.memory_space<vmem>>, %arg5: memref<16x16x128xf32, #tpu.memory_space<vmem>>) attributes {dimension_semantics = [#tpu.dimension_semantics<parallel>, #tpu.dimension_semantics<parallel>], iteration_bounds = array<i64: 1, 1>, scalar_prefetch = 0 : i64, scratch_operands = 0 : i64, tpu.core_type = #tpu.core_type<tc>, window_params = [{transform_indices = @transform_0, window_bounds = array<i64: 1, 16, 1, 128>}, {pipeline_mode = #tpu.pipeline_mode<synchronous>, transform_indices = @transform_1, window_bounds = array<i64: 1, 16, 128>}, {pipeline_mode = #tpu.pipeline_mode<synchronous>, transform_indices = @transform_2, window_bounds = array<i64: 128, 128>}, {transform_indices = @transform_3, window_bounds = array<i64: 16, 16, 128>}]} {
    %c0 = arith.constant 0 : index
    %c0_0 = arith.constant 0 : index
    %c0_1 = arith.constant 0 : index
    %c0_2 = arith.constant 0 : index
    %0 = vector.load %arg2[%c0, %c0_0, %c0_1, %c0_2] : memref<1x16x1x128xf32, #tpu.memory_space<vmem>>, vector<1x16x1x128xf32>
    %1 = vector.shape_cast %0 : vector<1x16x1x128xf32> to vector<16x1x128xf32>
    %c0_3 = arith.constant 0 : index
    %c0_4 = arith.constant 0 : index
    %c0_5 = arith.constant 0 : index
    %2 = vector.load %arg3[%c0_3, %c0_4, %c0_5] : memref<1x16x128xf32, #tpu.memory_space<vmem>>, vector<1x16x128xf32>
    %3 = vector.broadcast %1 : vector<16x1x128xf32> to vector<16x16x128xf32>
    %4 = vector.broadcast %2 : vector<1x16x128xf32> to vector<16x16x128xf32>
    %5 = arith.addf %3, %4 : vector<16x16x128xf32>
    %6 = math.tanh %5 : vector<16x16x128xf32>
    %7 = vector.shape_cast %6 : vector<16x16x128xf32> to vector<256x128xf32>
    %c0_6 = arith.constant 0 : index
    %c0_7 = arith.constant 0 : index
    %8 = vector.load %arg4[%c0_6, %c0_7] : memref<128x128xf32, #tpu.memory_space<vmem>>, vector<128x128xf32>
    %cst = arith.constant dense<0.000000e+00> : vector<256x128xf32>
    %9 = tpu.matmul %7, %8, %cst {dimension_numbers = #tpu.dot_dimension_numbers<[1], [0], [0], [1], [0, 0, 1, 1], [], []>} : vector<256x128xf32>, vector<128x128xf32>, vector<256x128xf32> -> vector<256x128xf32>
    %10 = vector.shape_cast %9 : vector<256x128xf32> to vector<16x16x128xf32>
    %c0_8 = arith.constant 0 : index
    %c0_9 = arith.constant 0 : index
    %c0_10 = arith.constant 0 : index
    %11 = vector.load %arg5[%c0_8, %c0_9, %c0_10] : memref<16x16x128xf32, #tpu.memory_space<vmem>>, vector<16x16x128xf32>
    tpu.vector_store %arg5[%c0_8, %c0_9, %c0_10], %10 {strides = array<i32>} : memref<16x16x128xf32, #tpu.memory_space<vmem>>, vector<16x16x128xf32>,
    return
  }
  func.func @transform_0(%arg0: i32, %arg1: i32) -> (i32, i32, i32, i32) {
    %c0_i32 = arith.constant 0 : i32
    %c0_i32_0 = arith.constant 0 : i32
    %c0_i32_1 = arith.constant 0 : i32
    return %arg1, %arg0, %c0_i32, %c0_i32_0 : i32, i32, i32, i32
  }
  func.func @transform_1(%arg0: i32, %arg1: i32) -> (i32, i32, i32) {
    %c0_i32 = arith.constant 0 : i32
    %c0_i32_0 = arith.constant 0 : i32
    %c0_i32_1 = arith.constant 0 : i32
    %c0_i32_2 = arith.constant 0 : i32
    return %c0_i32, %c0_i32_0, %c0_i32_1 : i32, i32, i32
  }
  func.func @transform_2(%arg0: i32, %arg1: i32) -> (i32, i32) {
    %c0_i32 = arith.constant 0 : i32
    %c0_i32_0 = arith.constant 0 : i32
    %c0_i32_1 = arith.constant 0 : i32
    return %c0_i32, %c0_i32_0 : i32, i32
  }
  func.func @transform_3(%arg0: i32, %arg1: i32) -> (i32, i32, i32) {
    %c0_i32 = arith.constant 0 : i32
    %c0_i32_0 = arith.constant 0 : i32
    return %arg0, %c0_i32, %arg1 : i32, i32, i32
  }
}

</mosaic_0001>

<bundles_post_ra>
// kernel: tpu_custom_call.1
= control target key start
LH: loop header
LB: loop body
LE: loop exit
PB: predicated region body
PF: predicated region fallthrough
CT: control target
= control target key end

     0   :  { %8 = vsyncpa [#allocation3], 0  ;;  %s1004_s0 = inlined_call_operand.hbm [shape: f32[1,16,1,128], index: 0, kind: input, shape index: {}]   ;;  %s1005_s1 = inlined_call_operand.hbm [shape: f32[1,16,128], index: 1, kind: input, shape index: {}]   ;;  %s1006_s2 = inlined_call_operand.hbm [shape: f32[128,128], index: 2, kind: input, shape index: {}]   ;;  %s1007_s3 = inlined_call_operand.hbm [shape: f32[16,16,128], index: 3, kind: output, shape index: {}]  }
   0x1   :  { %9 = vsyncpa [#allocation6], 0 }
   0x2   :  { %10 = vsyncpa [#allocation4], 0  ;;  %s883_s12 = smov [#allocation5]   ;;  %s789_s16 = scalar_lea.hbm %s1005_s1, 256 }
   0x3   :  { %s28_s13 = sshll.u32 %s883_s12, 4  ;;  %p790_p0 = scmp.ne.s32.totalorder %s1005_s1, %s789_s16  ;;  %s29_s13 = int_to_ptr.vmem [resolvable:$true] %s28_s13 }
   0x4   :  { %p793_p1 = scmp.lt.u32.totalorder %s789_s16, %s1005_s1 }
   0x6   :  { %p795_p2 = pnand %p793_p1, %p790_p0 }
   0x8   :  { %798 = shalt.err (!%p795_p2)
}
   0x9   :  { %s799_s21 = scalar_lea.vmem %s29_s13, 256  ;;  %p804_p4 = scmp.lt.s32.totalorder %s29_s13, %s29_s13 }
   0xa   :  { %p800_p3 = scmp.ne.s32.totalorder %s29_s13, %s799_s21  ;;  %p805_p5 = scmp.lt.s32.totalorder %s799_s21, %s799_s21 }
   0xc   :  { %p806_p6 = por %p805_p5, %p804_p4 }
   0xe   :  { %p807_p7 = pnand %p806_p6, %p800_p3 }
  0x10   :  { %810 = shalt.err (!%p807_p7)
}
  0x11   :  { %s884_s22 = smov 128   ;;  %s885_s23 = smov 8  }
  0x12   :  { %34 = dma.hbm_to_vmem [thread:$0]  %s1005_s1, 256, %s29_s13, [#allocation6], %s884_s22, %s884_s22, %s885_s23  }
  0x13   :  { %s886_s26 = smov [#allocation2]   ;;  %s811_s30 = scalar_lea.hbm %s1004_s0, 256 }
  0x14   :  { %s16_s27 = sshll.u32 %s886_s26, 4  ;;  %p812_p8 = scmp.ne.s32.totalorder %s1004_s0, %s811_s30  ;;  %s17_s27 = int_to_ptr.vmem [resolvable:$true] %s16_s27 }
  0x15   :  { %p815_p9 = scmp.lt.u32.totalorder %s811_s30, %s1004_s0 }
  0x17   :  { %p817_p10 = pnand %p815_p9, %p812_p8 }
  0x19   :  { %820 = shalt.err (!%p817_p10)
}
  0x1a   :  { %s821_s8 = scalar_lea.vmem %s17_s27, 256  ;;  %p826_p12 = scmp.lt.s32.totalorder %s17_s27, %s17_s27 }
  0x1b   :  { %p822_p11 = scmp.ne.s32.totalorder %s17_s27, %s821_s8  ;;  %p827_p13 = scmp.lt.s32.totalorder %s821_s8, %s821_s8 }
  0x1d   :  { %p828_p0 = por %p827_p13, %p826_p12 }
  0x1f   :  { %p829_p1 = pnand %p828_p0, %p822_p11 }
  0x21   :  { %832 = shalt.err (!%p829_p1)
}
  0x22   :  { %s887_s1 = smov 16   ;;  %s888_s9 = smov 1  }
  0x23   :  { %22 = dma.hbm_to_vmem [thread:$0]  %s1004_s0, 256, %s17_s27, [#allocation3], %s887_s1, %s887_s1, %s888_s9  }
  0x24   :  { %s889_s12 = smov [#allocation7]   ;;  %s833_s16 = scalar_lea.hbm %s1006_s2, 2048 }
  0x25   :  { %s40_s13 = sshll.u32 %s889_s12, 4  ;;  %p834_p2 = scmp.ne.s32.totalorder %s1006_s2, %s833_s16  ;;  %s41_s13 = int_to_ptr.vmem [resolvable:$true] %s40_s13 }
  0x26   :  { %p837_p3 = scmp.lt.u32.totalorder %s833_s16, %s1006_s2 }
  0x28   :  { %p839_p4 = pnand %p837_p3, %p834_p2 }
  0x2a   :  { %842 = shalt.err (!%p839_p4)
}
  0x2b   :  { %s843_s21 = scalar_lea.vmem %s41_s13, 2048  ;;  %p848_p6 = scmp.lt.s32.totalorder %s41_s13, %s41_s13 }
  0x2c   :  { %p844_p5 = scmp.ne.s32.totalorder %s41_s13, %s843_s21  ;;  %p849_p7 = scmp.lt.s32.totalorder %s843_s21, %s843_s21 }
  0x2e   :  { %p850_p8 = por %p849_p7, %p848_p6 }
  0x30   :  { %p851_p9 = pnand %p850_p8, %p844_p5 }
  0x32   :  { %854 = shalt.err (!%p851_p9)
}
  0x33   :  { %46 = dma.hbm_to_vmem [thread:$0]  %s1006_s2, 2048, %s41_s13, [#allocation6], %s884_s22, %s884_s22, %s885_s23  }
  0x34   :  { %877 = dma.done.wait [#allocation3], 256  }
  0x35   :  { %878 = vsyncadd [#allocation3], 4294967040 }
  0x36   :  { %879 = dma.done.wait [#allocation6], 2304  }
  0x37   :  { %880 = vsyncadd [#allocation6], 4294964992  ;;  %v234_v0 = vld [vmem:[#allocation7] sm:$0xff]  ;;  %v235_v1 = vld [vmem:[#allocation7 + $0x8] sm:$0xff]  ;;  %s890_s2 = smov [#allocation8]  }
  0x38   :  { %v236_v2 = vld [vmem:[#allocation7 + $0x10] sm:$0xff]  ;;  %v669_v3 = vpack.c.bf16 %v235_v1, %v234_v0  ;;  %v237_v4 = vld [vmem:[#allocation7 + $0x18] sm:$0xff]  ;;  %v238_v6 = vld [vmem:[#allocation7 + $0x20] sm:$0xff]  ;;  %s512_s25 = sshll.u32 %s890_s2, 4  ;;  %s513_s25 = int_to_ptr.vmem [resolvable:$true] %s512_s25 }
  0x39   :  { %v673_v5 = vpack.c.bf16 %v237_v4, %v236_v2  ;;  %v239_v7 = vld [vmem:[#allocation7 + $0x28] sm:$0xff]  ;;  %v525_v9 = vld [vmem:[#allocation2] ss:$0 sm:$0xff]  ;;  %v953_v10 = vld [vmem:[#allocation5] sm:$0xff]  ;;  %s855_s26 = scalar_lea.vmem %s513_s25, 4096  ;;  %p860_p11 = scmp.lt.s32.totalorder %s513_s25, %s513_s25 }
  0x3a   :  { %670 = vmatprep.subr.bf16.mxu0 %v669_v3  ;;  %701 = vmatprep.subr.bf16.mxu1 %v669_v3  ;;  %v677_v8 = vpack.c.bf16 %v239_v7, %v238_v6  ;;  %v240_v11 = vld [vmem:[#allocation7 + $0x30] sm:$0xff]  ;;  %v241_v12 = vld [vmem:[#allocation7 + $0x38] sm:$0xff]  ;;  %v170_v13 = vadd.f32 %v525_v9, %v953_v10  ;;  %v533_v14 = vld [vmem:[#allocation2 + $0x8] ss:$0 sm:$0xff]  ;;  %p856_p10 = scmp.ne.s32.totalorder %s513_s25, %s855_s26  ;;  %p861_p12 = scmp.lt.s32.totalorder %s855_s26, %s855_s26 }
  0x3b   :  { %672 = vmatpush3.bf16.msra.mxu0 %v669_v3  ;;  %709 = vmatpush3.bf16.msra.mxu1 %v669_v3  ;;  %v186_v15 = vadd.f32 %v533_v14, %v953_v10  ;;  %v681_v16 = vpack.c.bf16 %v241_v12, %v240_v11  ;;  %v242_v17 = vld [vmem:[#allocation7 + $0x40] sm:$0xff]  ;;  %v243_v18 = vld [vmem:[#allocation7 + $0x48] sm:$0xff]  ;;  %v957_v20 = vld [vmem:[#allocation5 + $0x8] sm:$0xff] }
  0x3c   :  { %674 = vmatprep.subr.bf16.mxu0 %v673_v5  ;;  %702 = vmatprep.subr.bf16.mxu1 %v673_v5  ;;  %725 = vtanh.f32 %v170_v13  ;;  %v685_v19 = vpack.c.bf16 %v243_v18, %v242_v17  ;;  %v244_v21 = vld [vmem:[#allocation7 + $0x50] sm:$0xff]  ;;  %v245_v22 = vld [vmem:[#allocation7 + $0x58] sm:$0xff]  ;;  %v526_v23 = vld [vmem:[#allocation2 + $0x1] ss:$0 sm:$0xff]  ;;  %v171_v24 = vadd.f32 %v525_v9, %v957_v20  ;;  %v187_v27 = vadd.f32 %v533_v14, %v957_v20  ;;  %p862_p13 = por %p861_p12, %p860_p11 }
  0x3d   :  { %727 = vtanh.f32 %v186_v15  ;;  %v534_v25 = vld [vmem:[#allocation2 + $0x9] ss:$0 sm:$0xff]  ;;  %v689_v26 = vpack.c.bf16 %v245_v22, %v244_v21  ;;  %v246_v29 = vld [vmem:[#allocation7 + $0x60] sm:$0xff]  ;;  %v172_v31 = vadd.f32 %v526_v23, %v953_v10  ;;  %v173_v35 = vadd.f32 %v526_v23, %v957_v20  ;;  %v535_v36 = vld [vmem:[#allocation2 + $0xa] ss:$0 sm:$0xff] }
  0x3e   :  { %v247_v30 = vld [vmem:[#allocation7 + $0x68] sm:$0xff]  ;;  %v188_v32 = vadd.f32 %v534_v25, %v953_v10  ;;  %v527_v33 = vld [vmem:[#allocation2 + $0x2] ss:$0 sm:$0xff]  ;;  %729 = vtanh.f32 %v171_v24  ;;  %v189_v38 = vadd.f32 %v534_v25, %v957_v20  ;;  %v248_v39 = vld [vmem:[#allocation7 + $0x70] sm:$0xff]  ;;  %v190_v42 = vadd.f32 %v535_v36, %v953_v10  ;;  %p863_p0 = pnand %p862_p13, %p856_p10 }
  0x3f   :  { %676 = vmatpush3.bf16.msra.mxu0 %v673_v5  ;;  %710 = vmatpush3.bf16.msra.mxu1 %v673_v5  ;;  %v693_v37 = vpack.c.bf16 %v247_v30, %v246_v29  ;;  %731 = vtanh.f32 %v187_v27  ;;  %v249_v40 = vld [vmem:[#allocation7 + $0x78] sm:$0xff]  ;;  %v174_v41 = vadd.f32 %v527_v33, %v953_v10  ;;  %v528_v43 = vld [vmem:[#allocation2 + $0x3] ss:$0 sm:$0xff]  ;;  %v175_v44 = vadd.f32 %v527_v33, %v957_v20  ;;  %v536_v45 = vld [vmem:[#allocation2 + $0xb] ss:$0 sm:$0xff] }
  0x40   :  { %678 = vmatprep.subr.bf16.mxu0 %v677_v8  ;;  %703 = vmatprep.subr.bf16.mxu1 %v677_v8  ;;  %733 = vtanh.f32 %v172_v31  ;;  %v697_v46 = vpack.c.bf16 %v249_v40, %v248_v39  ;;  %v191_v47 = vadd.f32 %v535_v36, %v957_v20  ;;  %v176_v48 = vadd.f32 %v528_v43, %v953_v10  ;;  %v529_v50 = vld [vmem:[#allocation2 + $0x4] ss:$0 sm:$0xff]  ;;  %v537_v52 = vld [vmem:[#allocation2 + $0xc] ss:$0 sm:$0xff]  ;;  %v530_v58 = vld [vmem:[#allocation2 + $0x5] ss:$0 sm:$0xff] }
  0x41   :  { %735 = vtanh.f32 %v188_v32  ;;  %v192_v49 = vadd.f32 %v536_v45, %v953_v10  ;;  %v177_v51 = vadd.f32 %v528_v43, %v957_v20  ;;  %v193_v53 = vadd.f32 %v536_v45, %v957_v20  ;;  %v538_v61 = vld [vmem:[#allocation2 + $0xd] ss:$0 sm:$0xff]  ;;  %v531_v4 = vld [vmem:[#allocation2 + $0x6] ss:$0 sm:$0xff]  ;;  %v539_v7 = vld [vmem:[#allocation2 + $0xe] ss:$0 sm:$0xff] }
  0x42   :  { %737 = vtanh.f32 %v173_v35  ;;  %v178_v55 = vadd.f32 %v529_v50, %v953_v10  ;;  %v194_v57 = vadd.f32 %v537_v52, %v953_v10  ;;  %v179_v60 = vadd.f32 %v529_v50, %v957_v20  ;;  %v532_v15 = vld [vmem:[#allocation2 + $0x7] ss:$0 sm:$0xff]  ;;  %v540_v18 = vld [vmem:[#allocation2 + $0xf] ss:$0 sm:$0xff] }
  0x43   :  { %680 = vmatpush3.bf16.msra.mxu0 %v677_v8  ;;  %711 = vmatpush3.bf16.msra.mxu1 %v677_v8  ;;  %739 = vtanh.f32 %v189_v38  ;;  %v195_v63 = vadd.f32 %v537_v52, %v957_v20  ;;  %v180_v1 = vadd.f32 %v530_v58, %v953_v10  ;;  %v196_v3 = vadd.f32 %v538_v61, %v953_v10 }
  0x44   :  { %682 = vmatprep.subr.bf16.mxu0 %v681_v16  ;;  %704 = vmatprep.subr.bf16.mxu1 %v681_v16  ;;  %741 = vtanh.f32 %v174_v41  ;;  %v181_v6 = vadd.f32 %v530_v58, %v957_v20  ;;  %v197_v9 = vadd.f32 %v538_v61, %v957_v20  ;;  %v182_v12 = vadd.f32 %v531_v4, %v953_v10 }
  0x45   :  { %743 = vtanh.f32 %v190_v42  ;;  %v198_v14 = vadd.f32 %v539_v7, %v953_v10  ;;  %v183_v17 = vadd.f32 %v531_v4, %v957_v20  ;;  %v199_v21 = vadd.f32 %v539_v7, %v957_v20 }
  0x46   :  { %v726_v28 = vpop.eup %725  ;;  %745 = vtanh.f32 %v175_v44  ;;  %v184_v23 = vadd.f32 %v532_v15, %v953_v10  ;;  %v200_v25 = vadd.f32 %v540_v18, %v953_v10  ;;  %v201_v30 = vadd.f32 %v540_v18, %v957_v20 }
  0x47   :  { %684 = vmatpush3.bf16.msra.mxu0 %v681_v16  ;;  %712 = vmatpush3.bf16.msra.mxu1 %v681_v16  ;;  %v728_v34 = vpop.eup %727  ;;  %747 = vtanh.f32 %v191_v47 }
  0x48   :  { %686 = vmatprep.subr.bf16.mxu0 %v685_v19  ;;  %705 = vmatprep.subr.bf16.mxu1 %v685_v19  ;;  %v730_v54 = vpop.eup %729  ;;  %749 = vtanh.f32 %v176_v48 }
  0x49   :  { %621 = vmatprep.mubr.f32.mxu0 %v726_v28  ;;  %645 = vmatprep.mubr.f32.mxu1 %v728_v34  ;;  %v732_v56 = vpop.eup %731  ;;  %751 = vtanh.f32 %v192_v49  ;;  %v185_v28 = vadd.f32 %v532_v15, %v957_v20 }
  0x4a   :  { %v734_v59 = vpop.eup %733  ;;  %753 = vtanh.f32 %v177_v51 }
  0x4b   :  { %688 = vmatpush3.bf16.msra.mxu0 %v685_v19  ;;  %713 = vmatpush3.bf16.msra.mxu1 %v685_v19  ;;  %v736_v62 = vpop.eup %735  ;;  %755 = vtanh.f32 %v193_v53 }
  0x4c   :  { %690 = vmatprep.subr.bf16.mxu0 %v689_v26  ;;  %706 = vmatprep.subr.bf16.mxu1 %v689_v26  ;;  %v738_v0 = vpop.eup %737  ;;  %757 = vtanh.f32 %v178_v55 }
  0x4d   :  { %v740_v2 = vpop.eup %739  ;;  %759 = vtanh.f32 %v194_v57 }
  0x4e   :  { %v742_v5 = vpop.eup %741  ;;  %761 = vtanh.f32 %v179_v60 }
  0x4f   :  { %692 = vmatpush3.bf16.msra.mxu0 %v689_v26  ;;  %714 = vmatpush3.bf16.msra.mxu1 %v689_v26  ;;  %v744_v8 = vpop.eup %743  ;;  %763 = vtanh.f32 %v195_v63 }
  0x50   :  { %694 = vmatprep.subr.bf16.mxu0 %v693_v37  ;;  %707 = vmatprep.subr.bf16.mxu1 %v693_v37  ;;  %v746_v11 = vpop.eup %745  ;;  %765 = vtanh.f32 %v180_v1 }
  0x51   :  { %v748_v13 = vpop.eup %747  ;;  %767 = vtanh.f32 %v196_v3 }
  0x52   :  { %v750_v16 = vpop.eup %749  ;;  %769 = vtanh.f32 %v181_v6 }
  0x53   :  { %696 = vmatpush3.bf16.msra.mxu0 %v693_v37  ;;  %715 = vmatpush3.bf16.msra.mxu1 %v693_v37  ;;  %v752_v19 = vpop.eup %751  ;;  %771 = vtanh.f32 %v197_v9 }
  0x54   :  { %698 = vmatprep.subr.bf16.mxu0 %v697_v46  ;;  %708 = vmatprep.subr.bf16.mxu1 %v697_v46  ;;  %v754_v22 = vpop.eup %753  ;;  %773 = vtanh.f32 %v182_v12 }
  0x55   :  { %v756_v24 = vpop.eup %755  ;;  %775 = vtanh.f32 %v198_v14 }
  0x56   :  { %v758_v26 = vpop.eup %757  ;;  %777 = vtanh.f32 %v183_v17 }
  0x57   :  { %700 = vmatpush3.bf16.msra.mxu0 %v697_v46  ;;  %716 = vmatpush3.bf16.msra.mxu1 %v697_v46  ;;  %v760_v27 = vpop.eup %759  ;;  %779 = vtanh.f32 %v199_v21 }
  0x58   :  { %v762_v29 = vpop.eup %761  ;;  %781 = vtanh.f32 %v184_v23 }
  0x59   :  { %v764_v31 = vpop.eup %763  ;;  %783 = vtanh.f32 %v200_v25 }
  0x5a   :  { %622 = vmatmul.mubr.f32.vlgmr.msra.gmra.mrb[0].mxu0 %v730_v54  ;;  %646 = vmatmul.mubr.f32.vlgmr.msra.gmra.mrb[0].mxu1 %v732_v56  ;;  %v766_v32 = vpop.eup %765  ;;  %785 = vtanh.f32 %v185_v28 }
  0x5b   :  { %624 = vmatprep.mubr.f32.mxu0 %v734_v59  ;;  %648 = vmatprep.mubr.f32.mxu1 %v736_v62  ;;  %v768_v10 = vpop.eup %767  ;;  %787 = vtanh.f32 %v201_v30 }
  0x5c   :  { %v770_v33 = vpop.eup %769 }
  0x5d   :  { %v772_v34 = vpop.eup %771 }
  0x5e   :  { %625 = vmatmul.mubr.f32.gmra.mrb[2].mxu0 %v738_v0  ;;  %649 = vmatmul.mubr.f32.gmra.mrb[2].mxu1 %v740_v2  ;;  %v774_v35 = vpop.eup %773 }
  0x5f   :  { %627 = vmatprep.mubr.f32.mxu0 %v742_v5  ;;  %651 = vmatprep.mubr.f32.mxu1 %v744_v8  ;;  %v776_v36 = vpop.eup %775 }
  0x60   :  { %v778_v37 = vpop.eup %777 }
  0x61   :  { %v780_v20 = vpop.eup %779 }
  0x62   :  { %628 = vmatmul.mubr.f32.gmra.mrb[4].mxu0 %v746_v11  ;;  %652 = vmatmul.mubr.f32.gmra.mrb[4].mxu1 %v748_v13  ;;  %v782_v38 = vpop.eup %781 }
  0x63   :  { %630 = vmatprep.mubr.f32.mxu0 %v750_v16  ;;  %654 = vmatprep.mubr.f32.mxu1 %v752_v19  ;;  %v784_v39 = vpop.eup %783 }
  0x64   :  { %v786_v40 = vpop.eup %785 }
  0x65   :  { %v788_v41 = vpop.eup %787 }
  0x66   :  { %631 = vmatmul.mubr.f32.gmra.mrb[6].mxu0 %v754_v22  ;;  %655 = vmatmul.mubr.f32.gmra.mrb[6].mxu1 %v756_v24 }
  0x67   :  { %633 = vmatprep.mubr.f32.mxu0 %v758_v26  ;;  %657 = vmatprep.mubr.f32.mxu1 %v760_v27 }
  0x6a   :  { %634 = vmatmul.mubr.f32.gmra.mrb[8].mxu0 %v762_v29  ;;  %658 = vmatmul.mubr.f32.gmra.mrb[8].mxu1 %v764_v31 }
  0x6b   :  { %636 = vmatprep.mubr.f32.mxu0 %v766_v32  ;;  %660 = vmatprep.mubr.f32.mxu1 %v768_v10 }
  0x6e   :  { %637 = vmatmul.mubr.f32.gmra.mrb[10].mxu0 %v770_v33  ;;  %661 = vmatmul.mubr.f32.gmra.mrb[10].mxu1 %v772_v34 }
  0x6f   :  { %639 = vmatprep.mubr.f32.mxu0 %v774_v35  ;;  %663 = vmatprep.mubr.f32.mxu1 %v776_v36 }
  0x72   :  { %640 = vmatmul.mubr.f32.gmra.mrb[12].mxu0 %v778_v37  ;;  %664 = vmatmul.mubr.f32.gmra.mrb[12].mxu1 %v780_v20 }
  0x73   :  { %642 = vmatprep.mubr.f32.mxu0 %v782_v38  ;;  %666 = vmatprep.mubr.f32.mxu1 %v784_v39 }
  0x76   :  { %643 = vmatmul.mubr.f32.gmra.mrb[14].mxu0 %v786_v40  ;;  %667 = vmatmul.mubr.f32.gmra.mrb[14].mxu1 %v788_v41 }
 0x12d   :  { %v623_v42 = vpop.f32.mrb[0].mxu0  ;;  %v647_v43 = vpop.f32.mrb[0].mxu1 }
 0x12e   :  { %476 = vst [vmem:[#allocation8 + $0x8] sm:$0xff] %v623_v42  ;;  %492 = vst [vmem:[#allocation8 + $0x88] sm:$0xff] %v647_v43  ;;  %v316_v44 = vpop.f32.mrb[1].mxu0  ;;  %v396_v45 = vpop.f32.mrb[1].mxu1 }
 0x12f   :  { %475 = vst [vmem:[#allocation8] sm:$0xff] %v316_v44  ;;  %491 = vst [vmem:[#allocation8 + $0x80] sm:$0xff] %v396_v45 }
 0x131   :  { %v626_v46 = vpop.f32.mrb[2].mxu0  ;;  %v650_v47 = vpop.f32.mrb[2].mxu1 }
 0x132   :  { %478 = vst [vmem:[#allocation8 + $0x18] sm:$0xff] %v626_v46  ;;  %494 = vst [vmem:[#allocation8 + $0x98] sm:$0xff] %v650_v47  ;;  %v326_v48 = vpop.f32.mrb[3].mxu0  ;;  %v406_v49 = vpop.f32.mrb[3].mxu1 }
 0x133   :  { %477 = vst [vmem:[#allocation8 + $0x10] sm:$0xff] %v326_v48  ;;  %493 = vst [vmem:[#allocation8 + $0x90] sm:$0xff] %v406_v49 }
 0x135   :  { %v629_v50 = vpop.f32.mrb[4].mxu0  ;;  %v653_v51 = vpop.f32.mrb[4].mxu1 }
 0x136   :  { %480 = vst [vmem:[#allocation8 + $0x28] sm:$0xff] %v629_v50  ;;  %496 = vst [vmem:[#allocation8 + $0xa8] sm:$0xff] %v653_v51  ;;  %v336_v52 = vpop.f32.mrb[5].mxu0  ;;  %v416_v53 = vpop.f32.mrb[5].mxu1 }
 0x137   :  { %479 = vst [vmem:[#allocation8 + $0x20] sm:$0xff] %v336_v52  ;;  %495 = vst [vmem:[#allocation8 + $0xa0] sm:$0xff] %v416_v53 }
 0x139   :  { %v632_v54 = vpop.f32.mrb[6].mxu0  ;;  %v656_v55 = vpop.f32.mrb[6].mxu1 }
 0x13a   :  { %482 = vst [vmem:[#allocation8 + $0x38] sm:$0xff] %v632_v54  ;;  %498 = vst [vmem:[#allocation8 + $0xb8] sm:$0xff] %v656_v55  ;;  %v346_v56 = vpop.f32.mrb[7].mxu0  ;;  %v426_v57 = vpop.f32.mrb[7].mxu1 }
 0x13b   :  { %481 = vst [vmem:[#allocation8 + $0x30] sm:$0xff] %v346_v56  ;;  %497 = vst [vmem:[#allocation8 + $0xb0] sm:$0xff] %v426_v57 }
 0x13d   :  { %v635_v58 = vpop.f32.mrb[8].mxu0  ;;  %v659_v59 = vpop.f32.mrb[8].mxu1 }
 0x13e   :  { %484 = vst [vmem:[#allocation8 + $0x48] sm:$0xff] %v635_v58  ;;  %500 = vst [vmem:[#allocation8 + $0xc8] sm:$0xff] %v659_v59  ;;  %v356_v60 = vpop.f32.mrb[9].mxu0  ;;  %v436_v61 = vpop.f32.mrb[9].mxu1 }
 0x13f   :  { %483 = vst [vmem:[#allocation8 + $0x40] sm:$0xff] %v356_v60  ;;  %499 = vst [vmem:[#allocation8 + $0xc0] sm:$0xff] %v436_v61 }
 0x141   :  { %v638_v62 = vpop.f32.mrb[10].mxu0  ;;  %v662_v63 = vpop.f32.mrb[10].mxu1 }
 0x142   :  { %486 = vst [vmem:[#allocation8 + $0x58] sm:$0xff] %v638_v62  ;;  %502 = vst [vmem:[#allocation8 + $0xd8] sm:$0xff] %v662_v63  ;;  %v366_v0 = vpop.f32.mrb[11].mxu0  ;;  %v446_v1 = vpop.f32.mrb[11].mxu1 }
 0x143   :  { %485 = vst [vmem:[#allocation8 + $0x50] sm:$0xff] %v366_v0  ;;  %501 = vst [vmem:[#allocation8 + $0xd0] sm:$0xff] %v446_v1 }
 0x145   :  { %v641_v2 = vpop.f32.mrb[12].mxu0  ;;  %v665_v3 = vpop.f32.mrb[12].mxu1 }
 0x146   :  { %488 = vst [vmem:[#allocation8 + $0x68] sm:$0xff] %v641_v2  ;;  %504 = vst [vmem:[#allocation8 + $0xe8] sm:$0xff] %v665_v3  ;;  %v376_v4 = vpop.f32.mrb[13].mxu0  ;;  %v456_v5 = vpop.f32.mrb[13].mxu1 }
 0x147   :  { %487 = vst [vmem:[#allocation8 + $0x60] sm:$0xff] %v376_v4  ;;  %503 = vst [vmem:[#allocation8 + $0xe0] sm:$0xff] %v456_v5 }
 0x149   :  { %v644_v6 = vpop.f32.mrb[14].mxu0  ;;  %v668_v7 = vpop.f32.mrb[14].mxu1 }
 0x14a   :  { %490 = vst [vmem:[#allocation8 + $0x78] sm:$0xff] %v644_v6  ;;  %506 = vst [vmem:[#allocation8 + $0xf8] sm:$0xff] %v668_v7  ;;  %v386_v8 = vpop.f32.mrb[15].mxu0  ;;  %v466_v9 = vpop.f32.mrb[15].mxu1 }
 0x14b   :  { %489 = vst [vmem:[#allocation8 + $0x70] sm:$0xff] %v386_v8  ;;  %505 = vst [vmem:[#allocation8 + $0xf0] sm:$0xff] %v466_v9 }
 0x14c   :  { %866 = shalt.err (!%p863_p0)
}
 0x14d   :  { %s867_s29 = scalar_lea.hbm %s1007_s3, 4096 }
 0x14e   :  { %p868_p1 = scmp.ne.s32.totalorder %s1007_s3, %s867_s29  ;;  %p871_p2 = scmp.lt.u32.totalorder %s867_s29, %s1007_s3 }
 0x150   :  { %p873_p3 = pnand %p871_p2, %p868_p1 }
 0x152   :  { %876 = shalt.err (!%p873_p3)
}
 0x153   :  { %518 = dma.vmem_to_hbm [thread:$0]  %s513_s25, 4096, %s1007_s3, [#allocation4], %s884_s22, %s884_s22, %s885_s23  }
 0x154   :  { %881 = dma.done.wait [#allocation4], 4096  }
 0x155   :  { %882 = vsyncadd [#allocation4], 4294963200 }
 0x156   :  { %522 = vsyncpa [#allocation3], 1 }
 0x157   :  { %523 = vsyncpa [#allocation6], 1 }
 0x158   :  { %524 = vsyncpa [#allocation4], 1 }

</bundles_post_ra>
